<compile_context>
chip_gen: v7x
topology: tpu7x:2x2x1
jax: 0.10.0
libtpu: 0.0.40
codegen_flags: <defaults>
</compile_context>

<pallas_src>
import functools

import jax
import jax.numpy as jnp
from jax.experimental import pallas as pl
from jax.experimental.pallas import tpu as pltpu


# ----------------------------------------------------------------------------- kernel
def _fused_net_kernel(num_layers, x_ref, *refs):
    """Whole-network forward.  refs = (Weff1, beff1, ..., WeffN, beffN, out)."""
    *param_refs, o_ref = refs

    x = x_ref[...]                                       # bf16 (tile_b, d_in)
    h = None
    for i in range(num_layers):
        w_ref, b_ref = param_refs[2 * i: 2 * i + 2]      # bf16 (di, do), f32 (1, do)
        h = jnp.dot(x, w_ref[...], preferred_element_type=jnp.float32) + b_ref[...]
        h = jnp.maximum(h, 0.0)                          # ReLU (incl. last layer, as in PyTorch)
        if i < num_layers - 1:
            x = h.astype(jnp.bfloat16)                   # activations stay on-chip

    # numerically-stable log_softmax over dim=1 on the last layer's activations
    m = jnp.max(h, axis=1, keepdims=True)
    shifted = h - m
    lse = jnp.log(jnp.sum(jnp.exp(shifted), axis=1, keepdims=True))
    o_ref[...] = shifted - lse


def _choose_tile_b(batch):
    """Batch tile: single step at small B; >=2 steps (v7x megacore) + <=512 at large B."""
    if batch <= 256:
        return batch
    half = pl.cdiv(batch, 2)
    tile = ((half + 15) // 16) * 16        # multiple of 16 for bf16 sublane packing
    return min(512, tile)


def _fused_forward_call(x_bf16, layer_params):
    """One pallas_call for the whole net.  layer_params[i] = (w_eff_bf16, b_eff_f32_row)."""
    B, d_in = x_bf16.shape
    num_layers = len(layer_params)
    d_out_final = layer_params[-1][0].shape[1]

    tile_b = _choose_tile_b(B)
    grid = (pl.cdiv(B, tile_b),)

    in_specs = [pl.BlockSpec((tile_b, d_in), lambda i: (i, 0))]
    flat_inputs = [x_bf16]
    for (w_eff, b_eff) in layer_params:
        di, do = w_eff.shape
        in_specs += [
            pl.BlockSpec((di, do), lambda i: (0, 0)),    # fused weight (bf16, resident)
            pl.BlockSpec((1, do), lambda i: (0, 0)),     # fused bias   (f32)
        ]
        flat_inputs += [w_eff, b_eff]

    return pl.pallas_call(
        functools.partial(_fused_net_kernel, num_layers),
        out_shape=jax.ShapeDtypeStruct((B, d_out_final), jnp.float32),
        grid=grid,
        in_specs=in_specs,
        out_specs=pl.BlockSpec((tile_b, d_out_final), lambda i: (i, 0)),
        compiler_params=pltpu.CompilerParams(dimension_semantics=("parallel",)),
    )(*flat_inputs)


# ----------------------------------------------------------------------------- model
class FcNetStochasticPallas:
    """JAX/Pallas re-implementation of FcNetStochastic's forward pass."""

    def __init__(self, layers, noise_scale, key):
        self.layers = list(layers)
        self.num_layers = len(layers) - 1
        self.noise_scale = float(noise_scale)
        # Master weights kept f32 (in, out) so (W + noise) is rounded to bf16 only once
        # per noise draw.  Biases are f32 rows (1, out).
        self.weights_t = []
        self.biases = []
        for i in range(self.num_layers):
            key, kw, kb = jax.random.split(key, 3)
            fan_in = layers[i]
            bound = 1.0 / float(jnp.sqrt(fan_in))
            w_t = jax.random.uniform(kw, (layers[i], layers[i + 1]),
                                     jnp.float32, -bound, bound)
            b = jax.random.uniform(kb, (1, layers[i + 1]),
                                   jnp.float32, -bound, bound)
            self.weights_t.append(w_t)
            self.biases.append(b)

    @property
    def num_parameters(self):
        return sum(w.size + b.size for w, b in zip(self.weights_t, self.biases))

    def set_noise(self, key):
        """noise = noise_scale * randn(num_parameters); fuse W+Wn, b+bn immediately.

        Weight noise is reshaped directly to (in, out): entries are iid Gaussian, so
        this is statistically equivalent to PyTorch's reshape-(out,in)-then-transpose
        and avoids a per-forward transpose.  The add happens in the same XLA fusion
        that draws the noise, so Wn never materializes in HBM as a separate array.
        (jax.random replaces torch.randn, so the draw is not bit-identical to PyTorch.)
        """
        flat = self.noise_scale * jax.random.normal(
            key, (self.num_parameters,), jnp.float32)
        self.fused_params = []
        counter = 0
        for i in range(self.num_layers):
            d_in, d_out = self.weights_t[i].shape
            msize = d_in * d_out
            nw = flat[counter:counter + msize].reshape(d_in, d_out)     # f32
            counter += msize
            nb = flat[counter:counter + d_out].reshape(1, d_out)        # f32
            counter += d_out
            w_eff = (self.weights_t[i] + nw).astype(jnp.bfloat16)       # single rounding
            b_eff = self.biases[i] + nb                                  # f32
            self.fused_params.append((w_eff, b_eff))

    def forward(self, x, noise_key):
        self.set_noise(noise_key)
        x = x.reshape(-1, 784).astype(jnp.bfloat16)      # x.view(-1, 784)
        return _fused_forward_call(x, self.fused_params)


# ----------------------------------------------------------------------------- reference (pure JAX) for sanity
def _reference_forward(model, x, noise_key):
    model.set_noise(noise_key)
    h = x.reshape(-1, 784).astype(jnp.bfloat16)
    a = None
    for i in range(model.num_layers):
        w_eff, b_eff = model.fused_params[i]
        a = jnp.dot(h, w_eff, preferred_element_type=jnp.float32) + b_eff
        a = jnp.maximum(a, 0.0)
        h = a.astype(jnp.bfloat16)
    return jax.nn.log_softmax(a, axis=1)


if __name__ == "__main__":
    key = jax.random.PRNGKey(0)
    key, k_param, k_x, k_noise = jax.random.split(key, 4)

    # layers[0] must be 784 because forward hard-codes x.view(-1, 784)
    layers = [784, 256, 128, 10]
    noise_scale = 0.05

    model = FcNetStochasticPallas(layers, noise_scale, k_param)

    # MNIST-like input, NCHW: (batch=8, 1, 28, 28) -> flattened to (8, 784)
    x = jax.random.normal(k_x, (8, 1, 28, 28), jnp.float32)

    out = model.forward(x, k_noise)
    out = jax.block_until_ready(out)

    ref = _reference_forward(model, x, k_noise)
    assert out.shape == (8, 10)
    assert out.dtype == jnp.float32
    assert jnp.allclose(out, ref, atol=1e-3, rtol=1e-3)
    # rows of log_softmax should sum (in prob space) to ~1
    assert jnp.allclose(jnp.exp(out).sum(axis=1), 1.0, atol=1e-3)

    print("KERNEL_OK")
</pallas_src>

<mosaic_0001>
module attributes {stable_mosaic.version = 11 : i64} {
  func.func @_fused_net_kernel(%arg0: i32, %arg1: memref<8x784xbf16, #tpu.memory_space<vmem>>, %arg2: memref<784x256xbf16, #tpu.memory_space<vmem>>, %arg3: memref<1x256xf32, #tpu.memory_space<vmem>>, %arg4: memref<256x128xbf16, #tpu.memory_space<vmem>>, %arg5: memref<1x128xf32, #tpu.memory_space<vmem>>, %arg6: memref<128x10xbf16, #tpu.memory_space<vmem>>, %arg7: memref<1x10xf32, #tpu.memory_space<vmem>>, %arg8: memref<8x10xf32, #tpu.memory_space<vmem>>) attributes {dimension_semantics = [#tpu.dimension_semantics<parallel>], iteration_bounds = array<i64: 1>, scalar_prefetch = 0 : i64, scratch_operands = 0 : i64, tpu.core_type = #tpu.core_type<tc>, window_params = [{transform_indices = @transform_0, window_bounds = array<i64: 8, 784>}, {pipeline_mode = #tpu.pipeline_mode<synchronous>, transform_indices = @transform_1, window_bounds = array<i64: 784, 256>}, {pipeline_mode = #tpu.pipeline_mode<synchronous>, transform_indices = @transform_2, window_bounds = array<i64: 1, 256>}, {pipeline_mode = #tpu.pipeline_mode<synchronous>, transform_indices = @transform_3, window_bounds = array<i64: 256, 128>}, {pipeline_mode = #tpu.pipeline_mode<synchronous>, transform_indices = @transform_4, window_bounds = array<i64: 1, 128>}, {pipeline_mode = #tpu.pipeline_mode<synchronous>, transform_indices = @transform_5, window_bounds = array<i64: 128, 10>}, {pipeline_mode = #tpu.pipeline_mode<synchronous>, transform_indices = @transform_6, window_bounds = array<i64: 1, 10>}, {transform_indices = @transform_7, window_bounds = array<i64: 8, 10>}]} {
    %c0 = arith.constant 0 : index
    %c0_0 = arith.constant 0 : index
    %0 = vector.load %arg1[%c0, %c0_0] : memref<8x784xbf16, #tpu.memory_space<vmem>>, vector<8x784xbf16>
    %c0_1 = arith.constant 0 : index
    %c0_2 = arith.constant 0 : index
    %1 = vector.load %arg2[%c0_1, %c0_2] : memref<784x256xbf16, #tpu.memory_space<vmem>>, vector<784x256xbf16>
    %cst = arith.constant dense<0.000000e+00> : vector<8x256xf32>
    %2 = tpu.matmul %0, %1, %cst {dimension_numbers = #tpu.dot_dimension_numbers<[1], [0], [0], [1], [0, 0, 1, 1], [], []>} : vector<8x784xbf16>, vector<784x256xbf16>, vector<8x256xf32> -> vector<8x256xf32>
    %c0_3 = arith.constant 0 : index
    %c0_4 = arith.constant 0 : index
    %3 = vector.load %arg3[%c0_3, %c0_4] : memref<1x256xf32, #tpu.memory_space<vmem>>, vector<1x256xf32>
    %4 = vector.broadcast %3 : vector<1x256xf32> to vector<8x256xf32>
    %5 = arith.addf %2, %4 : vector<8x256xf32>
    %cst_5 = arith.constant 0.000000e+00 : f32
    %6 = vector.broadcast %cst_5 : f32 to vector<8x256xf32>
    %7 = arith.maximumf %5, %6 : vector<8x256xf32>
    %8 = arith.truncf %7 : vector<8x256xf32> to vector<8x256xbf16>
    %c0_6 = arith.constant 0 : index
    %c0_7 = arith.constant 0 : index
    %9 = vector.load %arg4[%c0_6, %c0_7] : memref<256x128xbf16, #tpu.memory_space<vmem>>, vector<256x128xbf16>
    %cst_8 = arith.constant dense<0.000000e+00> : vector<8x128xf32>
    %10 = tpu.matmul %8, %9, %cst_8 {dimension_numbers = #tpu.dot_dimension_numbers<[1], [0], [0], [1], [0, 0, 1, 1], [], []>} : vector<8x256xbf16>, vector<256x128xbf16>, vector<8x128xf32> -> vector<8x128xf32>
    %c0_9 = arith.constant 0 : index
    %c0_10 = arith.constant 0 : index
    %11 = vector.load %arg5[%c0_9, %c0_10] : memref<1x128xf32, #tpu.memory_space<vmem>>, vector<1x128xf32>
    %12 = vector.broadcast %11 : vector<1x128xf32> to vector<8x128xf32>
    %13 = arith.addf %10, %12 : vector<8x128xf32>
    %cst_11 = arith.constant 0.000000e+00 : f32
    %14 = vector.broadcast %cst_11 : f32 to vector<8x128xf32>
    %15 = arith.maximumf %13, %14 : vector<8x128xf32>
    %16 = arith.truncf %15 : vector<8x128xf32> to vector<8x128xbf16>
    %c0_12 = arith.constant 0 : index
    %c0_13 = arith.constant 0 : index
    %17 = vector.load %arg6[%c0_12, %c0_13] : memref<128x10xbf16, #tpu.memory_space<vmem>>, vector<128x10xbf16>
    %cst_14 = arith.constant dense<0.000000e+00> : vector<8x10xf32>
    %18 = tpu.matmul %16, %17, %cst_14 {dimension_numbers = #tpu.dot_dimension_numbers<[1], [0], [0], [1], [0, 0, 1, 1], [], []>} : vector<8x128xbf16>, vector<128x10xbf16>, vector<8x10xf32> -> vector<8x10xf32>
    %c0_15 = arith.constant 0 : index
    %c0_16 = arith.constant 0 : index
    %19 = vector.load %arg7[%c0_15, %c0_16] : memref<1x10xf32, #tpu.memory_space<vmem>>, vector<1x10xf32>
    %20 = vector.broadcast %19 : vector<1x10xf32> to vector<8x10xf32>
    %21 = arith.addf %18, %20 : vector<8x10xf32>
    %cst_17 = arith.constant 0.000000e+00 : f32
    %22 = vector.broadcast %cst_17 : f32 to vector<8x10xf32>
    %23 = arith.maximumf %21, %22 : vector<8x10xf32>
    %cst_18 = arith.constant dense<0xFF800000> : vector<8xf32>
    %24 = vector.multi_reduction <maximumf>, %23, %cst_18 [1] : vector<8x10xf32> to vector<8xf32>
    %25 = vector.shape_cast %24 : vector<8xf32> to vector<8x1xf32>
    %26 = vector.broadcast %25 : vector<8x1xf32> to vector<8x10xf32>
    %27 = arith.subf %23, %26 : vector<8x10xf32>
    %28 = math.exp %27 : vector<8x10xf32>
    %cst_19 = arith.constant dense<0.000000e+00> : vector<8xf32>
    %29 = vector.multi_reduction <add>, %28, %cst_19 [1] : vector<8x10xf32> to vector<8xf32>
    %30 = vector.shape_cast %29 : vector<8xf32> to vector<8x1xf32>
    %31 = math.log %30 : vector<8x1xf32>
    %32 = vector.broadcast %31 : vector<8x1xf32> to vector<8x10xf32>
    %33 = arith.subf %27, %32 : vector<8x10xf32>
    %c0_20 = arith.constant 0 : index
    %c0_21 = arith.constant 0 : index
    %34 = vector.load %arg8[%c0_20, %c0_21] : memref<8x10xf32, #tpu.memory_space<vmem>>, vector<8x10xf32>
    tpu.vector_store %arg8[%c0_20, %c0_21], %33 {strides = array<i32>} : memref<8x10xf32, #tpu.memory_space<vmem>>, vector<8x10xf32>,
    return
  }
  func.func @transform_0(%arg0: i32) -> (i32, i32) {
    %c0_i32 = arith.constant 0 : i32
    %c0_i32_0 = arith.constant 0 : i32
    return %arg0, %c0_i32 : i32, i32
  }
  func.func @transform_1(%arg0: i32) -> (i32, i32) {
    %c0_i32 = arith.constant 0 : i32
    %c0_i32_0 = arith.constant 0 : i32
    %c0_i32_1 = arith.constant 0 : i32
    return %c0_i32, %c0_i32_0 : i32, i32
  }
  func.func @transform_2(%arg0: i32) -> (i32, i32) {
    %c0_i32 = arith.constant 0 : i32
    %c0_i32_0 = arith.constant 0 : i32
    %c0_i32_1 = arith.constant 0 : i32
    return %c0_i32, %c0_i32_0 : i32, i32
  }
  func.func @transform_3(%arg0: i32) -> (i32, i32) {
    %c0_i32 = arith.constant 0 : i32
    %c0_i32_0 = arith.constant 0 : i32
    %c0_i32_1 = arith.constant 0 : i32
    return %c0_i32, %c0_i32_0 : i32, i32
  }
  func.func @transform_4(%arg0: i32) -> (i32, i32) {
    %c0_i32 = arith.constant 0 : i32
    %c0_i32_0 = arith.constant 0 : i32
    %c0_i32_1 = arith.constant 0 : i32
    return %c0_i32, %c0_i32_0 : i32, i32
  }
  func.func @transform_5(%arg0: i32) -> (i32, i32) {
    %c0_i32 = arith.constant 0 : i32
    %c0_i32_0 = arith.constant 0 : i32
    %c0_i32_1 = arith.constant 0 : i32
    return %c0_i32, %c0_i32_0 : i32, i32
  }
  func.func @transform_6(%arg0: i32) -> (i32, i32) {
    %c0_i32 = arith.constant 0 : i32
    %c0_i32_0 = arith.constant 0 : i32
    %c0_i32_1 = arith.constant 0 : i32
    return %c0_i32, %c0_i32_0 : i32, i32
  }
  func.func @transform_7(%arg0: i32) -> (i32, i32) {
    %c0_i32 = arith.constant 0 : i32
    %c0_i32_0 = arith.constant 0 : i32
    return %arg0, %c0_i32 : i32, i32
  }
}

</mosaic_0001>

<bundles_post_ra>
// kernel: tpu_custom_call.1
= control target key start
LH: loop header
LB: loop body
LE: loop exit
PB: predicated region body
PF: predicated region fallthrough
CT: control target
= control target key end

     0   :  { %12 = vsyncpa [#allocation3], 0  ;;  %s1780_s0 = inlined_call_operand.vmem [shape: bf16[8,784], index: 0, kind: input, shape index: {}]   ;;  %s1781_s1 = inlined_call_operand.hbm [shape: bf16[784,256], index: 1, kind: input, shape index: {}]   ;;  %s1782_s2 = inlined_call_operand.vmem [shape: f32[1,256], index: 2, kind: input, shape index: {}]   ;;  %s1783_s3 = inlined_call_operand.hbm [shape: bf16[256,128], index: 3, kind: input, shape index: {}]   ;;  %s1784_s4 = inlined_call_operand.vmem [shape: f32[1,128], index: 4, kind: input, shape index: {}]   ;;  %s1785_s5 = inlined_call_operand.vmem [shape: bf16[128,10], index: 5, kind: input, shape index: {}]   ;;  %s1786_s6 = inlined_call_operand.vmem [shape: f32[1,10], index: 6, kind: input, shape index: {}]   ;;  %s1787_s7 = inlined_call_operand.hbm [shape: f32[8,10], index: 7, kind: output, shape index: {}]  }
   0x1   :  { %13 = vsyncpa [#allocation6], 0 }
   0x2   :  { %14 = vsyncpa [#allocation4], 0  ;;  %s1634_s24 = smov [#allocation2]   ;;  %s1562_s28 = scalar_lea.hbm %s1781_s1, 12544 }
   0x3   :  { %s22_s25 = sshll.u32 %s1634_s24, 4  ;;  %p1563_p0 = scmp.ne.s32.totalorder %s1781_s1, %s1562_s28  ;;  %s23_s25 = int_to_ptr.vmem [resolvable:$true] %s22_s25 }
   0x4   :  { %p1566_p1 = scmp.lt.u32.totalorder %s1562_s28, %s1781_s1 }
   0x6   :  { %p1568_p2 = pnand %p1566_p1, %p1563_p0 }
   0x8   :  { %1571 = shalt.err (!%p1568_p2)
}
   0x9   :  { %s1572_s10 = scalar_lea.vmem %s23_s25, 12544  ;;  %p1577_p4 = scmp.lt.s32.totalorder %s23_s25, %s23_s25 }
   0xa   :  { %p1573_p3 = scmp.ne.s32.totalorder %s23_s25, %s1572_s10  ;;  %p1578_p5 = scmp.lt.s32.totalorder %s1572_s10, %s1572_s10 }
   0xc   :  { %p1579_p6 = por %p1578_p5, %p1577_p4 }
   0xe   :  { %p1580_p7 = pnand %p1579_p6, %p1573_p3 }
  0x10   :  { %1583 = shalt.err (!%p1580_p7)
}
  0x11   :  { %s1635_s11 = smov 128   ;;  %s1636_s12 = smov 8  }
  0x12   :  { %28 = dma.hbm_to_vmem [thread:$0]  %s1781_s1, 12544, %s23_s25, [#allocation3], %s1635_s11, %s1635_s11, %s1636_s12  }
  0x13   :  { %s1637_s15 = smov [#allocation5]   ;;  %s1584_s19 = scalar_lea.hbm %s1783_s3, 2048 }
  0x14   :  { %s36_s16 = sshll.u32 %s1637_s15, 4  ;;  %p1585_p8 = scmp.ne.s32.totalorder %s1783_s3, %s1584_s19  ;;  %s37_s16 = int_to_ptr.vmem [resolvable:$true] %s36_s16 }
  0x15   :  { %p1588_p9 = scmp.lt.u32.totalorder %s1584_s19, %s1783_s3 }
  0x17   :  { %p1590_p10 = pnand %p1588_p9, %p1585_p8 }
  0x19   :  { %1593 = shalt.err (!%p1590_p10)
}
  0x1a   :  { %s1594_s24 = scalar_lea.vmem %s37_s16, 2048  ;;  %p1599_p12 = scmp.lt.s32.totalorder %s37_s16, %s37_s16 }
  0x1b   :  { %p1595_p11 = scmp.ne.s32.totalorder %s37_s16, %s1594_s24  ;;  %p1600_p13 = scmp.lt.s32.totalorder %s1594_s24, %s1594_s24 }
  0x1d   :  { %p1601_p0 = por %p1600_p13, %p1599_p12 }
  0x1f   :  { %p1602_p1 = pnand %p1601_p0, %p1595_p11 }
  0x21   :  { %1605 = shalt.err (!%p1602_p1)
}
  0x22   :  { %s1638_s1 = smov 64   ;;  %s1639_s25 = smov 4  }
  0x23   :  { %42 = dma.hbm_to_vmem [thread:$0]  %s1783_s3, 2048, %s37_s16, [#allocation6], %s1638_s1, %s1638_s1, %s1639_s25  }
  0x24   :  { %1628 = dma.done.wait [#allocation3], 12544  }
  0x25   :  { %1629 = vsyncadd [#allocation3], 4294954752 }
  0x26   :  { %1630 = dma.done.wait [#allocation6], 2048  }
  0x27   :  { %1631 = vsyncadd [#allocation6], 4294965248  ;;  %v1380_v0 = vld [vmem:[#allocation2 + $0x104] ss:$8 sps:$4 sm:$0xff]   ;;  %v1382_v1 = vld [vmem:[#allocation2 + $0x100] ss:$8 sps:$4 sm:$0xff]  }
  0x28   :  { %729 = vmatprep.subr.bf16.mxu0 %v1380_v0  ;;  %v1383_v2 = vld [vmem:[#allocation2 + $0x114] ss:$8 sps:$4 sm:$0xff]   ;;  %v1385_v3 = vld [vmem:[#allocation2 + $0x110] ss:$8 sps:$4 sm:$0xff]   ;;  %v1386_v4 = vld [vmem:[#allocation2 + $0x124] ss:$8 sps:$4 sm:$0xff]  }
  0x29   :  { %730 = vmatpush1.bf16.msra.mxu0 %v1382_v1  ;;  %v1388_v5 = vld [vmem:[#allocation2 + $0x120] ss:$8 sps:$4 sm:$0xff]   ;;  %v1389_v6 = vld [vmem:[#allocation2 + $0x134] ss:$8 sps:$4 sm:$0xff]   ;;  %v1391_v7 = vld [vmem:[#allocation2 + $0x130] ss:$8 sps:$4 sm:$0xff]  }
  0x2a   :  { %731 = vmatprep.subr.bf16.mxu0 %v1383_v2  ;;  %v1392_v8 = vld [vmem:[#allocation2 + $0x144] ss:$8 sps:$4 sm:$0xff]   ;;  %v1394_v9 = vld [vmem:[#allocation2 + $0x140] ss:$8 sps:$4 sm:$0xff]   ;;  %v1395_v10 = vld [vmem:[#allocation2 + $0x154] ss:$8 sps:$4 sm:$0xff]  }
  0x2b   :  { %v1397_v11 = vld [vmem:[#allocation2 + $0x150] ss:$8 sps:$4 sm:$0xff]   ;;  %v1398_v12 = vld [vmem:[#allocation2 + $0x164] ss:$8 sps:$4 sm:$0xff]   ;;  %v1400_v15 = vld [vmem:[#allocation2 + $0x160] ss:$8 sps:$4 sm:$0xff]  }
  0x2c   :  { %v1711_v13 = vld [vmem:[%s1780_s0 + $0x8] sm:$0xff]  ;;  %v1401_v16 = vld [vmem:[#allocation2 + $0x174] ss:$8 sps:$4 sm:$0xff]   ;;  %v1403_v18 = vld [vmem:[#allocation2 + $0x170] ss:$8 sps:$4 sm:$0xff]   ;;  %vm684_vm0 = vcmask 130048  }
  0x2d   :  { %732 = vmatpush1.bf16.msra.mxu0 %v1385_v3  ;;  %v1178_v14 = vcombine.high %v1711_v13, %v1711_v13  ;;  %v1436_v17 = vld [vmem:[#allocation2 + $0x4] ss:$8 sps:$4 sm:$0xff]   ;;  %v1441_v19 = vld [vmem:[#allocation2] ss:$8 sps:$4 sm:$0xff]   ;;  %v1442_v20 = vld [vmem:[#allocation2 + $0x14] ss:$8 sps:$4 sm:$0xff]   ;;  %v1177_v57 = vcombine.low %v1711_v13, %v1711_v13 }
  0x2e   :  { %733 = vmatprep.subr.bf16.mxu0 %v1386_v4  ;;  %688 = vmatprep.subr.bf16.mxu1 %v1436_v17  ;;  %v1404_v21 = vld [vmem:[#allocation2 + $0x184] ss:$8 sps:$4 sm:$0xff]   ;;  %v1447_v22 = vld [vmem:[#allocation2 + $0x10] ss:$8 sps:$4 sm:$0xff]   ;;  %v1406_v24 = vld [vmem:[#allocation2 + $0x180] ss:$8 sps:$4 sm:$0xff]  }
  0x2f   :  { %761 = vmatprep.mubr.bf16.mxu0 %v1178_v14  ;;  %689 = vmatpush1.bf16.msra.mxu1 %v1441_v19  ;;  %v1448_v23 = vld [vmem:[#allocation2 + $0x24] ss:$8 sps:$4 sm:$0xff]   ;;  %v1407_v25 = vld [vmem:[#allocation2 + $0x194] ss:$8 sps:$4 sm:$0xff]   ;;  %v1453_v26 = vld [vmem:[#allocation2 + $0x20] ss:$8 sps:$4 sm:$0xff]  }
  0x30   :  { %690 = vmatprep.subr.bf16.mxu1 %v1442_v20  ;;  %v1454_v27 = vld [vmem:[#allocation2 + $0x34] ss:$8 sps:$4 sm:$0xff]   ;;  %v1409_v28 = vld [vmem:[#allocation2 + $0x190] ss:$8 sps:$4 sm:$0xff]   ;;  %v1410_v29 = vld [vmem:[#allocation2 + $0x1a4] ss:$8 sps:$4 sm:$0xff]  }
  0x31   :  { %734 = vmatpush1.bf16.msra.mxu0 %v1388_v5  ;;  %v1459_v30 = vld [vmem:[#allocation2 + $0x30] ss:$8 sps:$4 sm:$0xff]   ;;  %v1460_v31 = vld [vmem:[#allocation2 + $0x44] ss:$8 sps:$4 sm:$0xff]   ;;  %v1412_v32 = vld [vmem:[#allocation2 + $0x1a0] ss:$8 sps:$4 sm:$0xff]  }
  0x32   :  { %735 = vmatprep.subr.bf16.mxu0 %v1389_v6  ;;  %v1413_v33 = vld [vmem:[#allocation2 + $0x1b4] ss:$8 sps:$4 sm:$0xff]   ;;  %v1465_v34 = vld [vmem:[#allocation2 + $0x40] ss:$8 sps:$4 sm:$0xff]   ;;  %v1415_v36 = vld [vmem:[#allocation2 + $0x1b0] ss:$8 sps:$4 sm:$0xff]  }
  0x33   :  { %691 = vmatpush1.bf16.msra.mxu1 %v1447_v22  ;;  %v1466_v35 = vld [vmem:[#allocation2 + $0x54] ss:$8 sps:$4 sm:$0xff]   ;;  %v1416_v37 = vld [vmem:[#allocation2 + $0x1c4] ss:$8 sps:$4 sm:$0xff]   ;;  %v1471_v38 = vld [vmem:[#allocation2 + $0x50] ss:$8 sps:$4 sm:$0xff]  }
  0x34   :  { %692 = vmatprep.subr.bf16.mxu1 %v1448_v23  ;;  %v1472_v39 = vld [vmem:[#allocation2 + $0x64] ss:$8 sps:$4 sm:$0xff]   ;;  %v1418_v40 = vld [vmem:[#allocation2 + $0x1c0] ss:$8 sps:$4 sm:$0xff]   ;;  %v1419_v41 = vld [vmem:[#allocation2 + $0x1d4] ss:$8 sps:$4 sm:$0xff]  }
  0x35   :  { %736 = vmatpush1.bf16.msra.mxu0 %v1391_v7  ;;  %v1477_v42 = vld [vmem:[#allocation2 + $0x60] ss:$8 sps:$4 sm:$0xff]   ;;  %v1478_v43 = vld [vmem:[#allocation2 + $0x74] ss:$8 sps:$4 sm:$0xff]   ;;  %v1421_v44 = vld [vmem:[#allocation2 + $0x1d0] ss:$8 sps:$4 sm:$0xff]  }
  0x36   :  { %737 = vmatprep.subr.bf16.mxu0 %v1392_v8  ;;  %v1422_v45 = vld [vmem:[#allocation2 + $0x1e4] ss:$8 sps:$4 sm:$0xff]   ;;  %v1483_v46 = vld [vmem:[#allocation2 + $0x70] ss:$8 sps:$4 sm:$0xff]   ;;  %v1424_v48 = vld [vmem:[#allocation2 + $0x1e0] ss:$8 sps:$4 sm:$0xff]  }
  0x37   :  { %693 = vmatpush1.bf16.msra.mxu1 %v1453_v26  ;;  %v1484_v47 = vld [vmem:[#allocation2 + $0x84] ss:$8 sps:$4 sm:$0xff]   ;;  %v1425_v49 = vld [vmem:[#allocation2 + $0x1f4] ss:$8 sps:$4 sm:$0xff]   ;;  %v1489_v50 = vld [vmem:[#allocation2 + $0x80] ss:$8 sps:$4 sm:$0xff]  }
  0x38   :  { %694 = vmatprep.subr.bf16.mxu1 %v1454_v27  ;;  %v1490_v51 = vld [vmem:[#allocation2 + $0x94] ss:$8 sps:$4 sm:$0xff]   ;;  %v1427_v52 = vld [vmem:[#allocation2 + $0x1f0] ss:$8 sps:$4 sm:$0xff]   ;;  %v1432_v53 = vld [vmem:[#allocation2 + $0x204] ss:$8 sps:$4 sm:$0xff]  }
  0x39   :  { %738 = vmatpush1.bf16.msra.mxu0 %v1394_v9  ;;  %v1495_v54 = vld [vmem:[#allocation2 + $0x90] ss:$8 sps:$4 sm:$0xff]   ;;  %v1496_v55 = vld [vmem:[#allocation2 + $0xa4] ss:$8 sps:$4 sm:$0xff]   ;;  %v1430_v58 = vld [vmem:[#allocation2 + $0x200] ss:$8 sps:$4 sm:$0xff]  }
  0x3a   :  { %739 = vmatprep.subr.bf16.mxu0 %v1395_v10  ;;  %v1718_v56 = vld [vmem:[%s1780_s0 + $0x10] sm:$0xff]  ;;  %v1501_v61 = vld [vmem:[#allocation2 + $0xa0] ss:$8 sps:$4 sm:$0xff]   ;;  %v1440_v1 = vld [vmem:[#allocation2 + $0x224] ss:$8 sps:$4 sm:$0xff]   ;;  %vm1642_vm1 = vmmov 0  }
  0x3b   :  { %695 = vmatpush1.bf16.msra.mxu1 %v1459_v30  ;;  %v1180_v59 = vcombine.high %v1718_v56, %v1718_v56  ;;  %v1435_v60 = vld [vmem:[#allocation2 + $0x214] ss:$8 sps:$4 sm:$0xff]   ;;  %v1433_v63 = vld [vmem:[#allocation2 + $0x210] ss:$8 sps:$4 sm:$0xff]   ;;  %v56_v0 = vld [vmem:[%s1780_s0] sm:$0xff]  ;;  %vm1145_vm2 = vcmask 80896  }
  0x3c   :  { %696 = vmatprep.subr.bf16.mxu1 %v1460_v31  ;;  %v1502_v62 = vld [vmem:[#allocation2 + $0xb4] ss:$8 sps:$4 sm:$0xff]   ;;  %v1176_v2 = vcombine.high %v56_v0, %v56_v0  ;;  %v1507_v3 = vld [vmem:[#allocation2 + $0xb0] ss:$8 sps:$4 sm:$0xff]   ;;  %v1508_v4 = vld [vmem:[#allocation2 + $0xc4] ss:$8 sps:$4 sm:$0xff]   ;;  %v1175_v22 = vcombine.low %v56_v0, %v56_v0 }
  0x3d   :  { %740 = vmatpush1.bf16.msra.mxu0 %v1397_v11  ;;  %v1438_v5 = vld [vmem:[#allocation2 + $0x220] ss:$8 sps:$4 sm:$0xff]   ;;  %v1446_v6 = vld [vmem:[#allocation2 + $0x234] ss:$8 sps:$4 sm:$0xff]   ;;  %v1444_v9 = vld [vmem:[#allocation2 + $0x230] ss:$8 sps:$4 sm:$0xff]  }
  0x3e   :  { %741 = vmatprep.subr.bf16.mxu0 %v1398_v12  ;;  %720 = vmatprep.mubr.bf16.mxu1 %v1176_v2  ;;  %v1513_v7 = vld [vmem:[#allocation2 + $0xc0] ss:$8 sps:$4 sm:$0xff]   ;;  %v1514_v8 = vld [vmem:[#allocation2 + $0xd4] ss:$8 sps:$4 sm:$0xff]   ;;  %v1452_v10 = vld [vmem:[#allocation2 + $0x244] ss:$8 sps:$4 sm:$0xff]   ;;  %v160_v2 = vlaneseq }
  0x3f   :  { %697 = vmatpush1.bf16.msra.mxu1 %v1465_v34  ;;  %v1519_v11 = vld [vmem:[#allocation2 + $0xd0] ss:$8 sps:$4 sm:$0xff]   ;;  %v1450_v12 = vld [vmem:[#allocation2 + $0x240] ss:$8 sps:$4 sm:$0xff]   ;;  %v1522_v13 = vld [vmem:[#allocation2 + $0xe4] ss:$8 sps:$4 sm:$0xff]  }
  0x40   :  { %698 = vmatprep.subr.bf16.mxu1 %v1466_v35  ;;  %v1458_v14 = vld [vmem:[#allocation2 + $0x254] ss:$8 sps:$4 sm:$0xff]   ;;  %v1456_v17 = vld [vmem:[#allocation2 + $0x250] ss:$8 sps:$4 sm:$0xff]   ;;  %v1476_v27 = vld [vmem:[#allocation2 + $0x284] ss:$8 sps:$4 sm:$0xff]  }
  0x41   :  { %742 = vmatpush1.bf16.msra.mxu0 %v1400_v15  ;;  %v1527_v15 = vld [vmem:[#allocation2 + $0xe0] ss:$8 sps:$4 sm:$0xff]   ;;  %v1530_v19 = vld [vmem:[#allocation2 + $0xf0] ss:$8 sps:$4 sm:$0xff]   ;;  %v1470_v23 = vld [vmem:[#allocation2 + $0x274] ss:$8 sps:$4 sm:$0xff]  }
  0x42   :  { %743 = vmatprep.subr.bf16.mxu0 %v1401_v16  ;;  %v1528_v16 = vld [vmem:[#allocation2 + $0xf4] ss:$8 sps:$4 sm:$0xff]   ;;  %v1468_v26 = vld [vmem:[#allocation2 + $0x270] ss:$8 sps:$4 sm:$0xff]   ;;  %v1474_v30 = vld [vmem:[#allocation2 + $0x280] ss:$8 sps:$4 sm:$0xff]  }
  0x43   :  { %699 = vmatpush1.bf16.msra.mxu1 %v1471_v38  ;;  %v1534_v20 = vld [vmem:[#allocation5 + $0x40] sm:$0xff]   ;;  %v1488_v35 = vld [vmem:[#allocation2 + $0x2a4] ss:$8 sps:$4 sm:$0xff]   ;;  %v1486_v38 = vld [vmem:[#allocation2 + $0x2a0] ss:$8 sps:$4 sm:$0xff]  }
  0x44   :  { %700 = vmatprep.subr.bf16.mxu1 %v1472_v39  ;;  %v1482_v31 = vld [vmem:[#allocation2 + $0x294] ss:$8 sps:$4 sm:$0xff]   ;;  %v1480_v34 = vld [vmem:[#allocation2 + $0x290] ss:$8 sps:$4 sm:$0xff]  }
  0x45   :  { %744 = vmatpush1.bf16.msra.mxu0 %v1403_v18  ;;  %v1464_v18 = vld [vmem:[#allocation2 + $0x264] ss:$8 sps:$4 sm:$0xff]   ;;  %v1494_v39 = vld [vmem:[#allocation2 + $0x2b4] ss:$8 sps:$4 sm:$0xff]  }
  0x46   :  { %745 = vmatprep.subr.bf16.mxu0 %v1404_v21  ;;  %v1462_v21 = vld [vmem:[#allocation2 + $0x260] ss:$8 sps:$4 sm:$0xff]  }
  0x47   :  { %701 = vmatpush1.bf16.msra.mxu1 %v1477_v42  ;;  %v1500_v42 = vld [vmem:[#allocation2 + $0x2c4] ss:$8 sps:$4 sm:$0xff]  }
  0x48   :  { %702 = vmatprep.subr.bf16.mxu1 %v1478_v43  ;;  %v1498_v43 = vld [vmem:[#allocation2 + $0x2c0] ss:$8 sps:$4 sm:$0xff]  }
  0x49   :  { %746 = vmatpush1.bf16.msra.mxu0 %v1406_v24  ;;  %v1535_v24 = vld [vmem:[#allocation5] sm:$0xff]  }
  0x4a   :  { %747 = vmatprep.subr.bf16.mxu0 %v1407_v25  ;;  %v1536_v25 = vld [vmem:[#allocation5 + $0x48] sm:$0xff]  }
  0x4b   :  { %703 = vmatpush1.bf16.msra.mxu1 %v1483_v46  ;;  %v1512_v46 = vld [vmem:[#allocation2 + $0x2e4] ss:$8 sps:$4 sm:$0xff]  }
  0x4c   :  { %704 = vmatprep.subr.bf16.mxu1 %v1484_v47  ;;  %v1510_v47 = vld [vmem:[#allocation2 + $0x2e0] ss:$8 sps:$4 sm:$0xff]  }
  0x4d   :  { %748 = vmatpush1.bf16.msra.mxu0 %v1409_v28  ;;  %v1537_v28 = vld [vmem:[#allocation5 + $0x8] sm:$0xff]  }
  0x4e   :  { %749 = vmatprep.subr.bf16.mxu0 %v1410_v29  ;;  %v1538_v29 = vld [vmem:[#allocation5 + $0x50] sm:$0xff]  }
  0x4f   :  { %705 = vmatpush1.bf16.msra.mxu1 %v1489_v50  ;;  %v1526_v50 = vld [vmem:[#allocation2 + $0x304] ss:$8 sps:$4 sm:$0xff]  }
  0x50   :  { %706 = vmatprep.subr.bf16.mxu1 %v1490_v51  ;;  %v1179_v51 = vcombine.low %v1718_v56, %v1718_v56  ;;  %v1548_v56 = vld [vmem:[#allocation5 + $0x78] sm:$0xff]  }
  0x51   :  { %750 = vmatpush1.bf16.msra.mxu0 %v1412_v32  ;;  %v1539_v32 = vld [vmem:[#allocation5 + $0x10] sm:$0xff]  }
  0x52   :  { %751 = vmatprep.subr.bf16.mxu0 %v1413_v33  ;;  %v1540_v33 = vld [vmem:[#allocation5 + $0x58] sm:$0xff]  }
  0x53   :  { %707 = vmatpush1.bf16.msra.mxu1 %v1495_v54  ;;  %v1533_v54 = vld [vmem:[%s1780_s0 + $0x18] ss:$0 sps:$4 sm:$0xff]  }
  0x54   :  { %708 = vmatprep.subr.bf16.mxu1 %v1496_v55  ;;  %v1544_v55 = vld [vmem:[#allocation5 + $0x68] sm:$0xff]  }
  0x55   :  { %752 = vmatpush1.bf16.msra.mxu0 %v1415_v36  ;;  %v1541_v36 = vld [vmem:[#allocation5 + $0x18] sm:$0xff]  }
  0x56   :  { %753 = vmatprep.subr.bf16.mxu0 %v1416_v37  ;;  %v1542_v37 = vld [vmem:[#allocation5 + $0x60] sm:$0xff]  }
  0x57   :  { %709 = vmatpush1.bf16.msra.mxu1 %v1501_v61  ;;  %v1641_v61 = vmov 0.0  }
  0x58   :  { %710 = vmatprep.subr.bf16.mxu1 %v1502_v62 }
  0x59   :  { %754 = vmatpush1.bf16.msra.mxu0 %v1418_v40  ;;  %v1543_v40 = vld [vmem:[#allocation5 + $0x20] sm:$0xff]  }
  0x5a   :  { %755 = vmatprep.subr.bf16.mxu0 %v1419_v41  ;;  %v1492_v41 = vld [vmem:[#allocation2 + $0x2b0] ss:$8 sps:$4 sm:$0xff]  }
  0x5b   :  { %711 = vmatpush1.bf16.msra.mxu1 %v1507_v3  ;;  %v161_v3 = vshrl.u32 %v160_v2, 7 }
  0x5c   :  { %712 = vmatprep.subr.bf16.mxu1 %v1508_v4 }
  0x5d   :  { %756 = vmatpush1.bf16.msra.mxu0 %v1421_v44  ;;  %v1506_v44 = vld [vmem:[#allocation2 + $0x2d4] ss:$8 sps:$4 sm:$0xff]   ;;  %v162_v4 = vsub.s32 0, %v161_v3 }
  0x5e   :  { %757 = vmatprep.subr.bf16.mxu0 %v1422_v45  ;;  %v1504_v45 = vld [vmem:[#allocation2 + $0x2d0] ss:$8 sps:$4 sm:$0xff]  }
  0x5f   :  { %713 = vmatpush1.bf16.msra.mxu1 %v1513_v7 }
  0x60   :  { %714 = vmatprep.subr.bf16.mxu1 %v1514_v8 }
  0x61   :  { %758 = vmatpush1.bf16.msra.mxu0 %v1424_v48  ;;  %v1518_v48 = vld [vmem:[#allocation2 + $0x2f4] ss:$8 sps:$4 sm:$0xff]  }
  0x62   :  { %759 = vmatprep.subr.bf16.mxu0 %v1425_v49  ;;  %v1516_v49 = vld [vmem:[#allocation2 + $0x2f0] ss:$8 sps:$4 sm:$0xff]  }
  0x63   :  { %715 = vmatpush1.bf16.msra.mxu1 %v1519_v11 }
  0x64   :  { %716 = vmatprep.subr.bf16.mxu1 %v1522_v13 }
  0x65   :  { %760 = vmatpush1.bf16.msra.mxu0 %v1427_v52  ;;  %v1524_v52 = vld [vmem:[#allocation2 + $0x300] ss:$8 sps:$4 sm:$0xff]  }
  0x66   :  { %770 = vmatprep.subr.bf16.mxu0 %v1432_v53  ;;  %v1640_v53 = vmov 0  }
  0x67   :  { %717 = vmatpush1.bf16.msra.mxu1 %v1527_v15 }
  0x68   :  { %762 = vmatmul.mubr.bf16.vlgmr.msra.gmra.mrb[0].mxu0 %v1177_v57  ;;  %718 = vmatprep.subr.bf16.mxu1 %v1528_v16  ;;  %v1545_v57 = vld [vmem:[#allocation5 + $0x28] sm:$0xff]  }
  0x69   :  { %771 = vmatpush1.bf16.msra.mxu0 %v1430_v58  ;;  %802 = vmatprep.mubr.bf16.mxu0 %v1180_v59  ;;  %v1546_v58 = vld [vmem:[#allocation5 + $0x70] sm:$0xff]  }
  0x6a   :  { %772 = vmatprep.subr.bf16.mxu0 %v1435_v60  ;;  %v1547_v59 = vld [vmem:[#allocation5 + $0x30] sm:$0xff]   ;;  %v1549_v60 = vld [vmem:[#allocation5 + $0x38] sm:$0xff]  }
  0x6b   :  { %719 = vmatpush1.bf16.msra.mxu1 %v1530_v19 }
  0x6c   :  { %1307 = vmatprep.subr.bf16.mxu1 %v1534_v20  ;;  %v1550_v20 = vld [vmem:[%s1785_s5] sm:$0xff]  }
  0x6d   :  { %773 = vmatpush1.bf16.msra.mxu0 %v1433_v63 }
  0x6e   :  { %774 = vmatprep.subr.bf16.mxu0 %v1440_v1  ;;  %721 = vmatmul.mubr.bf16.vlgmr.msra.gmra.mrb[0].mxu1 %v1175_v22  ;;  %v1551_v22 = vld [vmem:[%s1785_s5 + $0x8] sm:$0xff]  }
  0x6f   :  { %1308 = vmatpush3.bf16.msra.mxu1 %v1535_v24  ;;  %v1553_v24 = vld [vmem:[%s1785_s5 + $0x18] sm:$0xff]  }
  0x70   :  { %1309 = vmatprep.subr.bf16.mxu1 %v1536_v25  ;;  %v1554_v25 = vld [vmem:[%s1785_s5 + $0x20] sm:$0xff]  }
  0x71   :  { %775 = vmatpush1.bf16.msra.mxu0 %v1438_v5  ;;  %v158_v5 = vld [vmem:[%s1782_s2] sm:$0x3] }
  0x72   :  { %776 = vmatprep.subr.bf16.mxu0 %v1446_v6  ;;  %v166_v6 = vsub.s32 1, %v161_v3  ;;  %v163_v7 = vrot.slane %v158_v5, %v162_v4 }
  0x73   :  { %1310 = vmatpush3.bf16.msra.mxu1 %v1537_v28  ;;  %v1557_v28 = vld [vmem:[%s1785_s5 + $0x38] sm:$0xff]  }
  0x74   :  { %1311 = vmatprep.subr.bf16.mxu1 %v1538_v29  ;;  %v167_v8 = vrot.slane %v158_v5, %v166_v6 }
  0x75   :  { %777 = vmatpush1.bf16.msra.mxu0 %v1444_v9 }
  0x76   :  { %778 = vmatprep.subr.bf16.mxu0 %v1452_v10 }
  0x77   :  { %1312 = vmatpush3.bf16.msra.mxu1 %v1539_v32 }
  0x78   :  { %1313 = vmatprep.subr.bf16.mxu1 %v1540_v33 }
  0x79   :  { %779 = vmatpush1.bf16.msra.mxu0 %v1450_v12 }
  0x7a   :  { %780 = vmatprep.subr.bf16.mxu0 %v1458_v14 }
  0x7b   :  { %1314 = vmatpush3.bf16.msra.mxu1 %v1541_v36 }
  0x7c   :  { %1315 = vmatprep.subr.bf16.mxu1 %v1542_v37 }
  0x7d   :  { %781 = vmatpush1.bf16.msra.mxu0 %v1456_v17 }
  0x7e   :  { %782 = vmatprep.subr.bf16.mxu0 %v1464_v18 }
  0x7f   :  { %1316 = vmatpush3.bf16.msra.mxu1 %v1543_v40 }
  0x80   :  { %1317 = vmatprep.subr.bf16.mxu1 %v1544_v55 }
  0x81   :  { %783 = vmatpush1.bf16.msra.mxu0 %v1462_v21 }
  0x82   :  { %784 = vmatprep.subr.bf16.mxu0 %v1470_v23  ;;  %v1552_v23 = vld [vmem:[%s1785_s5 + $0x10] sm:$0xff]  }
  0x83   :  { %1318 = vmatpush3.bf16.msra.mxu1 %v1545_v57 }
  0x84   :  { %1319 = vmatprep.subr.bf16.mxu1 %v1546_v58 }
  0x85   :  { %785 = vmatpush1.bf16.msra.mxu0 %v1468_v26  ;;  %v1555_v26 = vld [vmem:[%s1785_s5 + $0x28] sm:$0xff]  }
  0x86   :  { %786 = vmatprep.subr.bf16.mxu0 %v1476_v27  ;;  %v1556_v27 = vld [vmem:[%s1785_s5 + $0x30] sm:$0xff]  }
  0x87   :  { %1320 = vmatpush3.bf16.msra.mxu1 %v1547_v59 }
  0x88   :  { %1321 = vmatprep.subr.bf16.mxu1 %v1548_v56 }
  0x89   :  { %787 = vmatpush1.bf16.msra.mxu0 %v1474_v30  ;;  %v1281_v30 = vld [vmem:[%s1784_s4] ss:$0 sm:$0xff]  ;;  %s1643_s4 = smov [#allocation7]  }
  0x8a   :  { %788 = vmatprep.subr.bf16.mxu0 %v1482_v31  ;;  %s1165_s5 = sshll.u32 %s1643_s4, 4  ;;  %s1166_s5 = int_to_ptr.vmem [resolvable:$true] %s1165_s5 }
  0x8b   :  { %1322 = vmatpush3.bf16.msra.mxu1 %v1549_v60  ;;  %p1611_p3 = scmp.lt.s32.totalorder %s1166_s5, %s1166_s5 }
  0x8c   :  { %1338 = vmatprep.subr.bf16.mxu1 %v1641_v61 }
  0x8d   :  { %789 = vmatpush1.bf16.msra.mxu0 %v1480_v34 }
  0x8e   :  { %790 = vmatprep.subr.bf16.mxu0 %v1488_v35 }
  0x91   :  { %791 = vmatpush1.bf16.msra.mxu0 %v1486_v38  ;;  %v1298_v38 = vld [vmem:[%s1786_s6] ss:$0 sm:$0xff]  ;;  %s1606_s6 = scalar_lea.vmem %s1166_s5, 128 }
  0x92   :  { %792 = vmatprep.subr.bf16.mxu0 %v1494_v39  ;;  %p1607_p2 = scmp.ne.s32.totalorder %s1166_s5, %s1606_s6  ;;  %p1612_p4 = scmp.lt.s32.totalorder %s1606_s6, %s1606_s6 }
  0x94   :  { %p1613_p5 = por %p1612_p4, %p1611_p3 }
  0x95   :  { %793 = vmatpush1.bf16.msra.mxu0 %v1492_v41 }
  0x96   :  { %794 = vmatprep.subr.bf16.mxu0 %v1500_v42  ;;  %p1614_p6 = pnand %p1613_p5, %p1607_p2 }
  0x99   :  { %795 = vmatpush1.bf16.msra.mxu0 %v1498_v43 }
  0x9a   :  { %796 = vmatprep.subr.bf16.mxu0 %v1506_v44 }
  0x9d   :  { %797 = vmatpush1.bf16.msra.mxu0 %v1504_v45 }
  0x9e   :  { %798 = vmatprep.subr.bf16.mxu0 %v1512_v46 }
  0xa1   :  { %799 = vmatpush1.bf16.msra.mxu0 %v1510_v47 }
  0xa2   :  { %800 = vmatprep.subr.bf16.mxu0 %v1518_v48 }
  0xa5   :  { %801 = vmatpush1.bf16.msra.mxu0 %v1516_v49 }
  0xa6   :  { %811 = vmatprep.subr.bf16.mxu0 %v1526_v50 }
  0xa8   :  { %803 = vmatmul.mubr.bf16.vlgmr.msra.gmra.mrb[0].mxu0 %v1179_v51 }
  0xa9   :  { %812 = vmatpush1.bf16.msra.mxu0 %v1524_v52  ;;  %843 = vmatprep.mubr.bf16.mxu0 %v1640_v53 }
  0xb4   :  { %1280 = vmatmul.mubr.msk.bf16.vlgmr.msra.gmra.mrb[0].mxu0 %vm684_vm0, %v1533_v54 }
 0x141   :  { %v722_v62 = vpop.f32.mrb[0].mxu1 }
 0x142   :  { %v724_v63 = vpop.f32.mrb[1].mxu1  ;;  %v723_v9 = vadd.f32 %v722_v62, %v163_v7 }
 0x143   :  { %v726_v0 = vpop.f32.mrb[2].mxu1  ;;  %v725_v10 = vadd.f32 %v724_v63, %v167_v8 }
 0x144   :  { %v727_v1 = vpop.f32.mrb[3].mxu1 }
 0x187   :  { %v845_v11 = vpop.f32.mrb[0].mxu0 }
 0x188   :  { %v1359_v12 = vadd.f32 %v845_v11, %v723_v9  ;;  %v847_v13 = vpop.f32.mrb[1].mxu0 }
 0x189   :  { %v1361_v14 = vadd.f32 %v847_v13, %v725_v10  ;;  %v849_v15 = vpop.f32.mrb[2].mxu0 }
 0x18a   :  { %v852_v16 = vmax.f32 %v1359_v12, 0.0  ;;  %v850_v17 = vpop.f32.mrb[3].mxu0 }
 0x18b   :  { %v853_v18 = vmax.f32 %v1361_v14, 0.0 }
 0x18c   :  { %v854_v21 = vpack.c.bf16 %v852_v16, %v852_v16 }
 0x18d   :  { %v855_v19 = vpack.c.bf16 %v853_v18, %v853_v18 }
 0x18f   :  { %1023 = vmatprep.mubr.bf16.mxu1 %v855_v19 }
 0x190   :  { %1024 = vmatmul.mubr.bf16.vlgmr.msra.gmra.mrb[4].mxu1 %v854_v21 }
 0x191   :  { %1339 = vmatpush3.bf16.msra.mxu1 %v1550_v20  ;;  %1354 = vmatprep.mubr.msk.bf16.mxu1 %vm1642_vm1, %v1641_v61 }
 0x192   :  { %1340 = vmatprep.subr.bf16.mxu1 %v1641_v61 }
 0x195   :  { %1341 = vmatpush3.bf16.msra.mxu1 %v1551_v22 }
 0x196   :  { %1342 = vmatprep.subr.bf16.mxu1 %v1641_v61 }
 0x199   :  { %1343 = vmatpush3.bf16.msra.mxu1 %v1552_v23 }
 0x19a   :  { %1344 = vmatprep.subr.bf16.mxu1 %v1641_v61 }
 0x19d   :  { %1345 = vmatpush3.bf16.msra.mxu1 %v1553_v24 }
 0x19e   :  { %1346 = vmatprep.subr.bf16.mxu1 %v1641_v61 }
 0x1a1   :  { %1347 = vmatpush3.bf16.msra.mxu1 %v1554_v25 }
 0x1a2   :  { %1348 = vmatprep.subr.bf16.mxu1 %v1641_v61 }
 0x1a5   :  { %1349 = vmatpush3.bf16.msra.mxu1 %v1555_v26 }
 0x1a6   :  { %1350 = vmatprep.subr.bf16.mxu1 %v1641_v61 }
 0x1a9   :  { %1351 = vmatpush3.bf16.msra.mxu1 %v1556_v27 }
 0x1aa   :  { %1352 = vmatprep.subr.bf16.mxu1 %v1641_v61 }
 0x1ad   :  { %1353 = vmatpush3.bf16.msra.mxu1 %v1557_v28 }
 0x263   :  { %v1323_v29 = vpop.f32.mrb[4].mxu1 }
 0x264   :  { %v1324_v31 = vpop.f32.mrb[5].mxu1 }
 0x265   :  { %v1325_v32 = vadd.f32 %v1324_v31, %v1323_v29  ;;  %v1326_v33 = vpop.f32.mrb[6].mxu1 }
 0x266   :  { %v1327_v34 = vpop.f32.mrb[7].mxu1 }
 0x267   :  { %v1026_v35 = vadd.f32 %v1325_v32, %v1281_v30 }
 0x269   :  { %v1031_v36 = vmax.f32 %v1026_v35, 0.0 }
 0x26b   :  { %v1032_v37 = vpack.c.bf16 %v1031_v36, %v1031_v36 }
 0x26d   :  { %1355 = vmatmul.mubr.bf16.vlgmr.msra.gmra.mrb[8].mxu1 %v1032_v37 }
 0x340   :  { %v1138_v39 = vpop.f32.mrb[8].mxu1 }
 0x341   :  { %v1139_v40 = vadd.f32 %v1298_v38, %v1138_v39  ;;  %v1356_v41 = vpop.f32.mrb[9].mxu1 }
 0x342   :  { %v1141_v42 = vpop.f32.mrb[10].mxu1 }
 0x343   :  { %v1144_v43 = vmax.f32 %v1139_v40, 0.0  ;;  %v1357_v44 = vpop.f32.mrb[11].mxu1 }
 0x345   :  { %v1146_v45 = vsel %vm1145_vm2, %v1144_v43, -inf }
 0x346   :  { %1147 = vmax.xlane.f32.xlu0 %v1146_v45 }
 0x3d3   :  { %v1148_v46 = vpop.xlane.xlu0 %1147 }
 0x3d4   :  { %v1149_v47 = vsub.f32 %v1144_v43, %v1148_v46 }
 0x3d6   :  { %v1150_v48 = vmul.f32 1.442695, %v1149_v47 }
 0x3d8   :  { %1558 = vpow2.f32 %v1150_v48 }
 0x3e2   :  { %v1559_v49 = vpop.eup %1558 }
 0x3e3   :  { %v1152_v50 = vsel %vm1145_vm2, %v1559_v49, 0.0 }
 0x3e4   :  { %1153 = vadd.xlane.f32.xlu0 %v1152_v50 }
 0x471   :  { %v1154_v51 = vpop.xlane.xlu0 %1153 }
 0x472   :  { %1560 = vlog2.f32 %v1154_v51 }
 0x47c   :  { %v1561_v52 = vpop.eup %1560 }
 0x47d   :  { %v1156_v53 = vmul.f32 0.6931472, %v1561_v52 }
 0x47f   :  { %v1157_v54 = vsub.f32 %v1149_v47, %v1156_v53 }
 0x481   :  { %1158 = vst.msk [vmem:[#allocation7] sm:$0xff] %vm1145_vm2, %v1157_v54 }
 0x482   :  { %1617 = shalt.err (!%p1614_p6)
}
 0x483   :  { %s1618_s9 = scalar_lea.hbm %s1787_s7, 128 }
 0x484   :  { %p1619_p7 = scmp.ne.s32.totalorder %s1787_s7, %s1618_s9  ;;  %p1622_p8 = scmp.lt.u32.totalorder %s1618_s9, %s1787_s7 }
 0x486   :  { %p1624_p9 = pnand %p1622_p8, %p1619_p7 }
 0x488   :  { %1627 = shalt.err (!%p1624_p9)
}
 0x489   :  { %1168 = dma.vmem_to_hbm [thread:$0]  %s1166_s5, 128, %s1787_s7, [#allocation4]  }
 0x48a   :  { %1632 = dma.done.wait [#allocation4], 128  }
 0x48b   :  { %1633 = vsyncadd [#allocation4], 4294967168 }
 0x48c   :  { %1172 = vsyncpa [#allocation3], 1 }
 0x48d   :  { %1173 = vsyncpa [#allocation6], 1 }
 0x48e   :  { %1174 = vsyncpa [#allocation4], 1 }

</bundles_post_ra>
